<compile_context>
chip_gen: v7x
topology: tpu7x:2x2x1
jax: 0.10.0
libtpu: 0.0.40
codegen_flags: <defaults>
</compile_context>

<pallas_src>
import functools

import jax
import jax.numpy as jnp
from jax.experimental import pallas as pl
from jax.experimental.pallas import tpu as pltpu

LANES = 128      # vreg lane width
SUBLANES = 8     # vreg sublane count (f32)
CHUNK_ROWS = 512  # rows folded per inner loop iteration (64 f32 vregs ->
                  # ~256 KiB of f32 temporaries, independent of tile size)


def _tpu_config():
    """Per-generation tile / core-split / VMEM-limit choices."""
    try:
        kind = jax.devices()[0].device_kind.lower()
    except Exception:  # defensive: fall back to the most conservative sizing
        kind = ""
    if "v7" in kind:
        # 2 TCs/chip, ~3.2 TB/s per TC, 64 MiB VMEM per TC.
        return {"block_rows": 16384, "ncores": 2, "vmem_limit": 44 << 20}
    if "v6" in kind:
        # 1 TC, ~1.4 TB/s, 32 MiB default scoped VMEM (16 MiB pipeline fits).
        return {"block_rows": 8192, "ncores": 1, "vmem_limit": None}
    # v5e / unknown: 16 MiB default scoped VMEM -> 8 MiB pipeline + temps.
    return {"block_rows": 4096, "ncores": 1, "vmem_limit": None}


def _mse_kernel(yp_ref, yg_ref, out_ref, acc_ref, *,
                tm, chunk, n_blocks, bpc, rem):
    """Per-core partial sum of (yg - yp)^2 over a (ncores, blocks_per_core) grid.

    acc_ref : (8,128) f32 VMEM vector accumulator (VPU-only adds per step).
    out_ref : (1,1) f32 SMEM per-core partial sum (written once per core).
    """
    c = pl.program_id(0)          # parallel / core-split axis
    i = pl.program_id(1)          # sequential row-block axis (per core)
    g = c * bpc + i               # global row-block index
    n_chunks = tm // chunk

    @pl.when(i == 0)
    def _init():
        acc_ref[...] = jnp.zeros_like(acc_ref)

    def _fold(j, mask_rem):
        # (chunk,128) slice -> diff^2 -> fold onto the (8,128) accumulator.
        base = pl.multiple_of(j * chunk, chunk)
        yp = yp_ref[pl.ds(base, chunk), :].astype(jnp.float32)
        yg = yg_ref[pl.ds(base, chunk), :].astype(jnp.float32)
        d = yg - yp
        sq = d * d
        if mask_rem is not None:
            # Local (within-block) index mask: no global flat index, so no
            # int32 overflow for huge tensors; only runs for one block total.
            row = jax.lax.broadcasted_iota(jnp.int32, (chunk, LANES), 0)
            col = jax.lax.broadcasted_iota(jnp.int32, (chunk, LANES), 1)
            local = (j * chunk + row) * LANES + col
            sq = jnp.where(local < mask_rem, sq, 0.0)
        acc_ref[...] += sq.reshape(chunk // SUBLANES, SUBLANES, LANES).sum(axis=0)
        return 0

    @pl.when(g < n_blocks - 1)
    def _steady():
        jax.lax.fori_loop(0, n_chunks, lambda j, _: _fold(j, None), 0)

    @pl.when(g == n_blocks - 1)
    def _last():
        if rem == tm * LANES:      # static: last block is full -> no mask
            jax.lax.fori_loop(0, n_chunks, lambda j, _: _fold(j, None), 0)
        else:
            jax.lax.fori_loop(0, n_chunks, lambda j, _: _fold(j, rem), 0)

    # g > n_blocks - 1 only happens for clamped duplicate blocks on the
    # multi-core split; they contribute nothing.

    @pl.when(i == bpc - 1)
    def _final():
        out_ref[0, 0] = jnp.sum(acc_ref[...])   # single XLU reduce per core


def iqa_loss(y_pred, y, *, block_rows=None, ncores=None):
    """JAX/Pallas equivalent of IQALoss.forward(y_pred, y).

    y is a tuple/list whose first element is the ground-truth tensor with the
    same shape as y_pred. Returns a float32 scalar: mean((y[0] - y_pred)**2).
    """
    y_gt = y[0]
    assert y_gt.shape == y_pred.shape, "ground truth must match prediction shape"
    n_total = int(y_pred.size)
    assert n_total > 0

    cfg = _tpu_config()
    if block_rows is None:
        block_rows = cfg["block_rows"]
    if ncores is None:
        ncores = cfg["ncores"]
    vmem_limit = cfg["vmem_limit"]

    # Narrower dtypes stream fewer bytes per row: grow the row tile at constant
    # VMEM so per-step DMA stays large vs the fixed grid-step overhead.
    itemsize = jnp.dtype(y_pred.dtype).itemsize
    if itemsize < 4:
        block_rows *= 4 // itemsize          # bf16 -> 2x rows, int8/fp8 -> 4x
    elif itemsize > 4:
        block_rows = max(CHUNK_ROWS, block_rows * 4 // itemsize)

    # TODO(synk): jnp.ravel(...).reshape(rows, 128) may emit a relayout copy for
    # tensors whose trailing dims are not lane-aligned (e.g. HxW=16x16); if the
    # HLO shows a copy, tile the natural trailing layout with a 2-D grid plus an
    # in-kernel lane mask instead of flattening.
    yp = jnp.ravel(y_pred)
    yg = jnp.ravel(y_gt)

    # Pad only if not a multiple of one (8,128) vreg (typical sizes need none).
    vreg_elems = SUBLANES * LANES  # 1024
    padded = pl.cdiv(n_total, vreg_elems) * vreg_elems
    if padded != n_total:
        yp = jnp.pad(yp, (0, padded - n_total))
        yg = jnp.pad(yg, (0, padded - n_total))

    rows = padded // LANES                 # multiple of 8
    tm = min(block_rows, rows)             # small inputs -> one block
    chunk = min(CHUNK_ROWS, tm)
    while tm % chunk:                      # chunk must divide tm (multiple of 8)
        chunk -= SUBLANES

    n_blocks = pl.cdiv(rows, tm)
    ncores = max(1, min(ncores, n_blocks))
    bpc = pl.cdiv(n_blocks, ncores)        # row blocks per core
    rem = n_total - (n_blocks - 1) * tm * LANES   # valid elems in last block
    assert 0 < rem <= tm * LANES

    yp2d = yp.reshape(rows, LANES)
    yg2d = yg.reshape(rows, LANES)

    last_blk = n_blocks - 1
    if ncores == 1:
        in_map = lambda c, i: (i, 0)
    else:
        # Clamp so over-range blocks on the split axis never DMA out of bounds;
        # the kernel skips their contribution via the g > n_blocks-1 guard.
        in_map = lambda c, i: (jnp.minimum(c * bpc + i, last_blk), 0)

    kernel = functools.partial(
        _mse_kernel, tm=tm, chunk=chunk, n_blocks=n_blocks, bpc=bpc, rem=rem)

    cp_kwargs = {"dimension_semantics": ("parallel", "arbitrary")}
    if vmem_limit is not None:
        cp_kwargs["vmem_limit_bytes"] = vmem_limit

    partials = pl.pallas_call(
        kernel,
        out_shape=jax.ShapeDtypeStruct((ncores, 1), jnp.float32),
        grid_spec=pltpu.PrefetchScalarGridSpec(
            num_scalar_prefetch=0,
            grid=(ncores, bpc),
            in_specs=[
                pl.BlockSpec((tm, LANES), in_map),
                pl.BlockSpec((tm, LANES), in_map),
            ],
            out_specs=pl.BlockSpec(
                (1, 1), lambda c, i: (c, 0),
                memory_space=pltpu.MemorySpace.SMEM),
            scratch_shapes=[pltpu.VMEM((SUBLANES, LANES), jnp.float32)],
        ),
        compiler_params=pltpu.CompilerParams(**cp_kwargs),
    )(yp2d, yg2d)

    return jnp.sum(partials) / jnp.float32(n_total)


if __name__ == "__main__":
    key = jax.random.PRNGKey(0)
    k1, k2 = jax.random.split(key)

    # Small IQA-style shapes: batch=2, channels=4, spatial=16x16.
    y_pred = jax.random.normal(k1, (2, 4, 16, 16), dtype=jnp.float32)
    y_gt = jax.random.normal(k2, (2, 4, 16, 16), dtype=jnp.float32)
    y = (y_gt,)  # y[0] is the ground-truth label

    loss = iqa_loss(y_pred, y)
    jax.block_until_ready(loss)

    # Reference check in plain JAX.
    ref = jnp.mean((y_gt - y_pred) ** 2)
    assert jnp.allclose(loss, ref, rtol=1e-6, atol=1e-6), (loss, ref)

    print("KERNEL_OK")
</pallas_src>

<mosaic_0001>
module attributes {stable_mosaic.version = 11 : i64} {
  func.func @_mse_kernel(%arg0: i32, %arg1: i32, %arg2: memref<16x128xf32, #tpu.memory_space<vmem>>, %arg3: memref<16x128xf32, #tpu.memory_space<vmem>>, %arg4: memref<1x1xf32, #tpu.memory_space<smem>>, %arg5: memref<8x128xf32, #tpu.memory_space<vmem>>) attributes {dimension_semantics = [#tpu.dimension_semantics<parallel>, #tpu.dimension_semantics<arbitrary>], iteration_bounds = array<i64: 1, 1>, scalar_prefetch = 0 : i64, scratch_operands = 1 : i64, tpu.core_type = #tpu.core_type<tc>, window_params = [{transform_indices = @transform_0, window_bounds = array<i64: 16, 128>}, {transform_indices = @transform_1, window_bounds = array<i64: 16, 128>}, {transform_indices = @transform_2, window_bounds = array<i64: 1, 1>}]} {
    %c1_i32 = arith.constant 1 : i32
    %0 = arith.muli %arg0, %c1_i32 : i32
    %1 = arith.addi %0, %arg1 : i32
    %c0_i32 = arith.constant 0 : i32
    %2 = arith.cmpi eq, %arg1, %c0_i32 : i32
    %3 = arith.extui %2 : i1 to i32
    %c0_i32_0 = arith.constant 0 : i32
    %4 = arith.cmpi ne, %3, %c0_i32_0 : i32
    scf.if %4 {
      %cst = arith.constant 0.000000e+00 : f32
      %14 = vector.broadcast %cst : f32 to vector<8x128xf32>
      %c0 = arith.constant 0 : index
      %c0_7 = arith.constant 0 : index
      %15 = vector.load %arg5[%c0, %c0_7] : memref<8x128xf32, #tpu.memory_space<vmem>>, vector<8x128xf32>
      tpu.vector_store %arg5[%c0, %c0_7], %14 {strides = array<i32>} : memref<8x128xf32, #tpu.memory_space<vmem>>, vector<8x128xf32>,
    } else {
    }
    %c0_i32_1 = arith.constant 0 : i32
    %5 = arith.cmpi slt, %1, %c0_i32_1 : i32
    %6 = arith.extui %5 : i1 to i32
    %c0_i32_2 = arith.constant 0 : i32
    %7 = arith.cmpi ne, %6, %c0_i32_2 : i32
    scf.if %7 {
      %c0_i32_7 = arith.constant 0 : i32
      %c16_i32 = arith.constant 16 : i32
      %14 = arith.muli %c0_i32_7, %c16_i32 : i32
      %15 = tpu.assume_multiple %14, 16 : i32
      %16 = arith.index_cast %15 : i32 to index
      %c0 = arith.constant 0 : index
      %17 = vector.load %arg2[%16, %c0] : memref<16x128xf32, #tpu.memory_space<vmem>>, vector<16x128xf32>
      %18 = arith.index_cast %15 : i32 to index
      %c0_8 = arith.constant 0 : index
      %19 = vector.load %arg3[%18, %c0_8] : memref<16x128xf32, #tpu.memory_space<vmem>>, vector<16x128xf32>
      %20 = arith.subf %19, %17 : vector<16x128xf32>
      %21 = arith.mulf %20, %20 : vector<16x128xf32>
      %c0_9 = arith.constant 0 : index
      %c0_10 = arith.constant 0 : index
      %22 = vector.load %arg5[%c0_9, %c0_10] : memref<8x128xf32, #tpu.memory_space<vmem>>, vector<8x128xf32>
      %23 = vector.shape_cast %21 : vector<16x128xf32> to vector<2x8x128xf32>
      %cst = arith.constant dense<0.000000e+00> : vector<8x128xf32>
      %24 = vector.multi_reduction <add>, %23, %cst [0] : vector<2x8x128xf32> to vector<8x128xf32>
      %25 = arith.addf %22, %24 : vector<8x128xf32>
      %c0_11 = arith.constant 0 : index
      %c0_12 = arith.constant 0 : index
      %26 = vector.load %arg5[%c0_11, %c0_12] : memref<8x128xf32, #tpu.memory_space<vmem>>, vector<8x128xf32>
      tpu.vector_store %arg5[%c0_11, %c0_12], %25 {strides = array<i32>} : memref<8x128xf32, #tpu.memory_space<vmem>>, vector<8x128xf32>,
      %c1_i32_13 = arith.constant 1 : i32
    } else {
    }
    %c0_i32_3 = arith.constant 0 : i32
    %8 = arith.cmpi eq, %1, %c0_i32_3 : i32
    %9 = arith.extui %8 : i1 to i32
    %c0_i32_4 = arith.constant 0 : i32
    %10 = arith.cmpi ne, %9, %c0_i32_4 : i32
    scf.if %10 {
      %c0_i32_7 = arith.constant 0 : i32
      %c16_i32 = arith.constant 16 : i32
      %14 = arith.muli %c0_i32_7, %c16_i32 : i32
      %15 = tpu.assume_multiple %14, 16 : i32
      %16 = arith.index_cast %15 : i32 to index
      %c0 = arith.constant 0 : index
      %17 = vector.load %arg2[%16, %c0] : memref<16x128xf32, #tpu.memory_space<vmem>>, vector<16x128xf32>
      %18 = arith.index_cast %15 : i32 to index
      %c0_8 = arith.constant 0 : index
      %19 = vector.load %arg3[%18, %c0_8] : memref<16x128xf32, #tpu.memory_space<vmem>>, vector<16x128xf32>
      %20 = arith.subf %19, %17 : vector<16x128xf32>
      %21 = arith.mulf %20, %20 : vector<16x128xf32>
      %c0_9 = arith.constant 0 : index
      %c0_10 = arith.constant 0 : index
      %22 = vector.load %arg5[%c0_9, %c0_10] : memref<8x128xf32, #tpu.memory_space<vmem>>, vector<8x128xf32>
      %23 = vector.shape_cast %21 : vector<16x128xf32> to vector<2x8x128xf32>
      %cst = arith.constant dense<0.000000e+00> : vector<8x128xf32>
      %24 = vector.multi_reduction <add>, %23, %cst [0] : vector<2x8x128xf32> to vector<8x128xf32>
      %25 = arith.addf %22, %24 : vector<8x128xf32>
      %c0_11 = arith.constant 0 : index
      %c0_12 = arith.constant 0 : index
      %26 = vector.load %arg5[%c0_11, %c0_12] : memref<8x128xf32, #tpu.memory_space<vmem>>, vector<8x128xf32>
      tpu.vector_store %arg5[%c0_11, %c0_12], %25 {strides = array<i32>} : memref<8x128xf32, #tpu.memory_space<vmem>>, vector<8x128xf32>,
      %c1_i32_13 = arith.constant 1 : i32
    } else {
    }
    %c0_i32_5 = arith.constant 0 : i32
    %11 = arith.cmpi eq, %arg1, %c0_i32_5 : i32
    %12 = arith.extui %11 : i1 to i32
    %c0_i32_6 = arith.constant 0 : i32
    %13 = arith.cmpi ne, %12, %c0_i32_6 : i32
    scf.if %13 {
      %c0 = arith.constant 0 : index
      %c0_7 = arith.constant 0 : index
      %14 = vector.load %arg5[%c0, %c0_7] : memref<8x128xf32, #tpu.memory_space<vmem>>, vector<8x128xf32>
      %15 = vector.shape_cast %14 : vector<8x128xf32> to vector<1x8x128xf32>
      %cst = arith.constant dense<0.000000e+00> : vector<1xf32>
      %16 = vector.multi_reduction <add>, %15, %cst [1, 2] : vector<1x8x128xf32> to vector<1xf32>
      %17 = vector.shape_cast %16 : vector<1xf32> to vector<1x1x1xf32>
      %18 = vector.extract %17[0, 0, 0] : f32 from vector<1x1x1xf32>
      %c0_8 = arith.constant 0 : index
      %c0_9 = arith.constant 0 : index
      %19 = memref.load %arg4[%c0_8, %c0_9] : memref<1x1xf32, #tpu.memory_space<smem>>
      memref.store %18, %arg4[%c0_8, %c0_9] : memref<1x1xf32, #tpu.memory_space<smem>>
    } else {
    }
    return
  }
  func.func @transform_0(%arg0: i32, %arg1: i32) -> (i32, i32) {
    %c0_i32 = arith.constant 0 : i32
    %c0_i32_0 = arith.constant 0 : i32
    return %arg1, %c0_i32 : i32, i32
  }
  func.func @transform_1(%arg0: i32, %arg1: i32) -> (i32, i32) {
    %c0_i32 = arith.constant 0 : i32
    %c0_i32_0 = arith.constant 0 : i32
    return %arg1, %c0_i32 : i32, i32
  }
  func.func @transform_2(%arg0: i32, %arg1: i32) -> (i32, i32) {
    %c0_i32 = arith.constant 0 : i32
    %c0_i32_0 = arith.constant 0 : i32
    return %arg0, %c0_i32 : i32, i32
  }
}

</mosaic_0001>

<bundles_post_ra>
// kernel: tpu_custom_call.1
= control target key start
LH: loop header
LB: loop body
LE: loop exit
PB: predicated region body
PF: predicated region fallthrough
CT: control target
= control target key end

     0   :  { %7 = vsyncpa [#allocation4], 0  ;;  %s231_s0 = inlined_call_operand.hbm [shape: f32[16,128], index: 0, kind: input, shape index: {}]   ;;  %s232_s1 = inlined_call_operand.hbm [shape: f32[16,128], index: 1, kind: input, shape index: {}]   ;;  %s233_s2 = inlined_call_operand.hbm [shape: f32[1,1], index: 2, kind: output, shape index: {}]  }
   0x1   :  { %8 = vsyncpa [#allocation7], 0 }
   0x2   :  { %9 = vsyncpa [#allocation5], 0  ;;  %s175_s9 = smov [#allocation3]   ;;  %s115_s13 = scalar_lea.hbm %s231_s0, 256 }
   0x3   :  { %s15_s10 = sshll.u32 %s175_s9, 4  ;;  %p116_p0 = scmp.ne.s32.totalorder %s231_s0, %s115_s13  ;;  %s16_s10 = int_to_ptr.vmem [resolvable:$true] %s15_s10 }
   0x4   :  { %p119_p1 = scmp.lt.u32.totalorder %s115_s13, %s231_s0 }
   0x6   :  { %p121_p2 = pnand %p119_p1, %p116_p0 }
   0x8   :  { %124 = shalt.err (!%p121_p2)
}
   0x9   :  { %s125_s18 = scalar_lea.vmem %s16_s10, 256  ;;  %p130_p4 = scmp.lt.s32.totalorder %s16_s10, %s16_s10 }
   0xa   :  { %p126_p3 = scmp.ne.s32.totalorder %s16_s10, %s125_s18  ;;  %p131_p5 = scmp.lt.s32.totalorder %s125_s18, %s125_s18 }
   0xc   :  { %p132_p6 = por %p131_p5, %p130_p4 }
   0xe   :  { %p133_p7 = pnand %p132_p6, %p126_p3 }
  0x10   :  { %136 = shalt.err (!%p133_p7)
}
  0x11   :  { %s176_s19 = smov 128   ;;  %s177_s20 = smov 8  }
  0x12   :  { %21 = dma.hbm_to_vmem [thread:$0]  %s231_s0, 256, %s16_s10, [#allocation4], %s176_s19, %s176_s19, %s177_s20  }
  0x13   :  { %s178_s23 = smov [#allocation6]   ;;  %s137_s27 = scalar_lea.hbm %s232_s1, 256 }
  0x14   :  { %s27_s24 = sshll.u32 %s178_s23, 4  ;;  %p138_p8 = scmp.ne.s32.totalorder %s232_s1, %s137_s27  ;;  %s28_s24 = int_to_ptr.vmem [resolvable:$true] %s27_s24 }
  0x15   :  { %p141_p9 = scmp.lt.u32.totalorder %s137_s27, %s232_s1 }
  0x17   :  { %p143_p10 = pnand %p141_p9, %p138_p8 }
  0x19   :  { %146 = shalt.err (!%p143_p10)
}
  0x1a   :  { %s147_s4 = scalar_lea.vmem %s28_s24, 256  ;;  %p152_p12 = scmp.lt.s32.totalorder %s28_s24, %s28_s24 }
  0x1b   :  { %p148_p11 = scmp.ne.s32.totalorder %s28_s24, %s147_s4  ;;  %p153_p13 = scmp.lt.s32.totalorder %s147_s4, %s147_s4 }
  0x1d   :  { %p154_p0 = por %p153_p13, %p152_p12 }
  0x1f   :  { %p155_p1 = pnand %p154_p0, %p148_p11 }
  0x21   :  { %158 = shalt.err (!%p155_p1)
}
  0x22   :  { %33 = dma.hbm_to_vmem [thread:$0]  %s232_s1, 256, %s28_s24, [#allocation7], %s176_s19, %s176_s19, %s177_s20  }
  0x23   :  { %169 = dma.done.wait [#allocation4], 256  }
  0x24   :  { %170 = vsyncadd [#allocation4], 4294967040 }
  0x25   :  { %171 = dma.done.wait [#allocation7], 256  }
  0x26   :  { %172 = vsyncadd [#allocation7], 4294967040  ;;  %v66_v0 = vld [vmem:[#allocation3] sm:$0xff]  ;;  %v67_v1 = vld [vmem:[#allocation3 + $0x8] sm:$0xff]  ;;  %s159_s8 = scalar_lea.hbm %s233_s2, 16 }
  0x27   :  { %v68_v2 = vld [vmem:[#allocation6] sm:$0xff]  ;;  %v69_v3 = vld [vmem:[#allocation6 + $0x8] sm:$0xff]  ;;  %p160_p2 = scmp.ne.s32.totalorder %s233_s2, %s159_s8  ;;  %p163_p3 = scmp.lt.u32.totalorder %s159_s8, %s233_s2 }
  0x28   :  { %v70_v4 = vsub.f32 %v68_v2, %v66_v0  ;;  %v71_v5 = vsub.f32 %v69_v3, %v67_v1 }
  0x29   :  { %p165_p4 = pnand %p163_p3, %p160_p2 }
  0x2a   :  { %v72_v6 = vmul.f32 %v70_v4, %v70_v4  ;;  %v73_v7 = vmul.f32 %v71_v5, %v71_v5 }
  0x2c   :  { %v75_v8 = vadd.f32 %v73_v7, %v72_v6 }
  0x2e   :  { %82 = vadd.xlane.f32.xlu0 %v75_v8 }
  0xbb   :  { %v83_v9 = vpop.xlane.xlu0 %82 }
  0xbc   :  { %v84_v10 = vrot.slane %v83_v9, 4 }
  0xbe   :  { %v85_v11 = vadd.f32 %v84_v10, %v83_v9 }
  0xc0   :  { %v86_v12 = vrot.slane %v85_v11, 2 }
  0xc2   :  { %v87_v13 = vadd.f32 %v86_v12, %v85_v11 }
  0xc4   :  { %v88_v14 = vrot.slane %v87_v13, 1 }
  0xc6   :  { %v89_v15 = vadd.f32 %v88_v14, %v87_v13 }
  0xc8   :  { %108 = vpush %v89_v15 }
  0xf9   :  { %s109_s1 = spop %108 }
  0xfa   :  { %92 = sst [smem:[#allocation8]] %s109_s1 }
  0xfb   :  { %168 = shalt.err (!%p165_p4)
}
  0xfc   :  { %s179_s13 = smov [#allocation8]  }
  0xfd   :  { %100 = dma.smem_to_hbm %s179_s13, 16, %s233_s2, [#allocation5]  }
  0xfe   :  { %173 = dma.done.wait [#allocation5], 16  }
  0xff   :  { %174 = vsyncadd [#allocation5], 4294967280 }
 0x100   :  { %104 = sfence }
 0x101   :  { %105 = vsyncpa [#allocation4], 1 }
 0x102   :  { %106 = vsyncpa [#allocation7], 1 }
 0x103   :  { %107 = vsyncpa [#allocation5], 1 }

</bundles_post_ra>
